<compile_context>
chip_gen: v5e
topology: v5e:2x2
jax: 0.10.0
libtpu: 0.0.40
codegen_flags: <defaults>
</compile_context>

<pallas_src>
import functools

import jax
import jax.numpy as jnp
from jax.experimental import pallas as pl
from jax.experimental.pallas import tpu as pltpu

_LANE = 128      # lane width: pad final output columns to a multiple of this
_TM_MAX = 1024   # max batch-tile rows


def _round_up(n, m):
    return ((n + m - 1) // m) * m


def _mlp_kernel(x_ref, w1_ref, b1_ref, w2_ref, b2_ref, w3_ref, b3_ref, o_ref):
    """Fused 3-layer MLP on one (tile, input_dim) batch tile.

    Weights/biases are VMEM-resident (constant index_map). bf16 operands on
    the MXU, f32 accumulation; bias add + ReLU in f32 on the VPU. Biases are
    (1, N) and broadcast in-kernel.
    """
    x = x_ref[...].astype(jnp.bfloat16)                                # VPU cast (free slot)

    h1 = jnp.dot(x, w1_ref[...], preferred_element_type=jnp.float32) + b1_ref[...]
    h1 = jnp.maximum(h1, 0.0).astype(jnp.bfloat16)

    h2 = jnp.dot(h1, w2_ref[...], preferred_element_type=jnp.float32) + b2_ref[...]
    h2 = jnp.maximum(h2, 0.0).astype(jnp.bfloat16)

    out = jnp.dot(h2, w3_ref[...], preferred_element_type=jnp.float32) + b3_ref[...]
    o_ref[...] = out.astype(o_ref.dtype)                               # lane-dense (tile, 128k) store


def prepare_params(params):
    """One-time parameter prep (do NOT call per forward):

    * weights -> bf16 (MXU operands)
    * W3 / b3 zero-padded to a multiple of 128 output columns (lane-dense store)

    Returns (prepared_param_dict, true_out_dim).
    """
    out_dim = params["w3"].shape[1]
    out_pad = _round_up(out_dim, _LANE)

    w3 = params["w3"].astype(jnp.bfloat16)
    b3 = params["b3"].astype(jnp.float32)
    if out_pad != out_dim:
        w3 = jnp.pad(w3, ((0, 0), (0, out_pad - out_dim)))
        b3 = jnp.pad(b3, ((0, 0), (0, out_pad - out_dim)))

    prepared = {
        "w1": params["w1"].astype(jnp.bfloat16),
        "b1": params["b1"].astype(jnp.float32),
        "w2": params["w2"].astype(jnp.bfloat16),
        "b2": params["b2"].astype(jnp.float32),
        "w3": w3,
        "b3": b3,
    }
    return prepared, out_dim


def _pick_tile(batch):
    """Batch tile: <= _TM_MAX, multiple of 16 (bf16 sublane packing), <= batch
    for batch >= 16 so the only ragged block is the trailing one."""
    if batch >= 16:
        return min(_TM_MAX, (batch // 16) * 16)
    return 8


@functools.partial(jax.jit, static_argnames=("out_dim",))
def modifier_forward(x, prepared, *, out_dim):
    """x: [batch, input_dim] float32. prepared: output of prepare_params."""
    batch, in_dim = x.shape
    out_pad = prepared["w3"].shape[1]

    # Tiny-batch corner case only: blocks need >= 8 sublanes.
    pad_rows = 0
    if batch < 8:
        pad_rows = 8 - batch
        x = jnp.pad(x, ((0, pad_rows), (0, 0)))
    batch_p = batch + pad_rows

    tile = _pick_tile(batch_p)
    grid = (pl.cdiv(batch_p, tile),)   # ragged last block handled by Pallas

    tiled = lambda shape: pl.BlockSpec(shape, lambda i: (i, 0))      # per-batch-tile
    resident = lambda shape: pl.BlockSpec(shape, lambda i: (0, 0))   # VMEM-resident, DMA'd once

    out = pl.pallas_call(
        _mlp_kernel,
        out_shape=jax.ShapeDtypeStruct((batch_p, out_pad), jnp.float32),
        grid=grid,
        in_specs=[
            tiled((tile, in_dim)),
            resident(prepared["w1"].shape), resident(prepared["b1"].shape),
            resident(prepared["w2"].shape), resident(prepared["b2"].shape),
            resident(prepared["w3"].shape), resident(prepared["b3"].shape),
        ],
        out_specs=tiled((tile, out_pad)),
        compiler_params=pltpu.CompilerParams(
            dimension_semantics=("parallel",),   # multi-step grids shard across TCs on v7x
        ),
    )(x, prepared["w1"], prepared["b1"], prepared["w2"], prepared["b2"],
      prepared["w3"], prepared["b3"])

    if pad_rows:
        out = out[:batch]
    if out_pad != out_dim:
        out = out[:, :out_dim]   # drop the lane-padding columns (tiny copy)
    return out


def init_params(key, input_dim, output_dim, hidden_1, hidden_2):
    """Deterministic init mimicking nn.Linear's U(-1/sqrt(fan_in), 1/sqrt(fan_in))."""
    ks = jax.random.split(key, 6)

    def linear(kw, kb, fan_in, fan_out):
        bound = 1.0 / jnp.sqrt(fan_in)
        w = jax.random.uniform(kw, (fan_in, fan_out), jnp.float32, -bound, bound)
        b = jax.random.uniform(kb, (1, fan_out), jnp.float32, -bound, bound)
        return w, b

    w1, b1 = linear(ks[0], ks[1], input_dim, hidden_1)
    w2, b2 = linear(ks[2], ks[3], hidden_1, hidden_2)
    w3, b3 = linear(ks[4], ks[5], hidden_2, output_dim)
    return {"w1": w1, "b1": b1, "w2": w2, "b2": b2, "w3": w3, "b3": b3}


def _reference_f32(x, p):
    h1 = jnp.maximum(x @ p["w1"] + p["b1"], 0.0)
    h2 = jnp.maximum(h1 @ p["w2"] + p["b2"], 0.0)
    return h2 @ p["w3"] + p["b3"]


def _reference_bf16(x, p):
    """Mirrors the kernel numerics: bf16 operands, f32 accumulation/bias/ReLU."""
    xb = x.astype(jnp.bfloat16)
    w1 = p["w1"].astype(jnp.bfloat16)
    w2 = p["w2"].astype(jnp.bfloat16)
    w3 = p["w3"].astype(jnp.bfloat16)
    h1 = jnp.maximum(jnp.dot(xb, w1, preferred_element_type=jnp.float32) + p["b1"], 0.0)
    h1 = h1.astype(jnp.bfloat16)
    h2 = jnp.maximum(jnp.dot(h1, w2, preferred_element_type=jnp.float32) + p["b2"], 0.0)
    h2 = h2.astype(jnp.bfloat16)
    return jnp.dot(h2, w3, preferred_element_type=jnp.float32) + p["b3"]


if __name__ == "__main__":
    input_dim, output_dim, hidden_1, hidden_2 = 32, 16, 64, 48

    key = jax.random.PRNGKey(0)
    k_x, k_p = jax.random.split(key)
    params = init_params(k_p, input_dim, output_dim, hidden_1, hidden_2)
    prepared, od = prepare_params(params)   # one-time: bf16 weights + lane-padded W3/b3

    # batch=300 exercises the ragged trailing block (tile=288 -> 2 grid steps);
    # batch=8 exercises the tiny single-exact-tile path.
    for batch in (300, 8):
        x = jax.random.normal(jax.random.fold_in(k_x, batch),
                              (batch, input_dim), jnp.float32)

        out = modifier_forward(x, prepared, out_dim=od)
        out = jax.block_until_ready(out)
        assert out.shape == (batch, output_dim), out.shape

        # Tight check against a reference with identical bf16 numerics.
        ref_bf16 = _reference_bf16(x, params)
        assert jnp.allclose(out, ref_bf16, atol=1e-4, rtol=1e-3), (
            "mismatch vs bf16-matched JAX reference")

        # Loose sanity check against the pure-f32 module semantics.
        ref_f32 = _reference_f32(x, params)
        max_err = float(jnp.max(jnp.abs(out - ref_f32)))
        assert max_err < 0.1, f"f32 reference deviation too large: {max_err}"

    print("KERNEL_OK")
</pallas_src>

<mosaic_0001>
module attributes {stable_mosaic.version = 11 : i64} {
  func.func @_mlp_kernel(%arg0: i32, %arg1: memref<288x32xf32, #tpu.memory_space<vmem>>, %arg2: memref<32x64xbf16, #tpu.memory_space<vmem>>, %arg3: memref<1x64xf32, #tpu.memory_space<vmem>>, %arg4: memref<64x48xbf16, #tpu.memory_space<vmem>>, %arg5: memref<1x48xf32, #tpu.memory_space<vmem>>, %arg6: memref<48x128xbf16, #tpu.memory_space<vmem>>, %arg7: memref<1x128xf32, #tpu.memory_space<vmem>>, %arg8: memref<288x128xf32, #tpu.memory_space<vmem>>) attributes {dimension_semantics = [#tpu.dimension_semantics<parallel>], iteration_bounds = array<i64: 2>, scalar_prefetch = 0 : i64, scratch_operands = 0 : i64, tpu.core_type = #tpu.core_type<tc>, window_params = [{transform_indices = @transform_0, window_bounds = array<i64: 288, 32>}, {pipeline_mode = #tpu.pipeline_mode<synchronous>, transform_indices = @transform_1, window_bounds = array<i64: 32, 64>}, {pipeline_mode = #tpu.pipeline_mode<synchronous>, transform_indices = @transform_2, window_bounds = array<i64: 1, 64>}, {pipeline_mode = #tpu.pipeline_mode<synchronous>, transform_indices = @transform_3, window_bounds = array<i64: 64, 48>}, {pipeline_mode = #tpu.pipeline_mode<synchronous>, transform_indices = @transform_4, window_bounds = array<i64: 1, 48>}, {pipeline_mode = #tpu.pipeline_mode<synchronous>, transform_indices = @transform_5, window_bounds = array<i64: 48, 128>}, {pipeline_mode = #tpu.pipeline_mode<synchronous>, transform_indices = @transform_6, window_bounds = array<i64: 1, 128>}, {transform_indices = @transform_7, window_bounds = array<i64: 288, 128>}]} {
    %c0 = arith.constant 0 : index
    %c0_0 = arith.constant 0 : index
    %0 = vector.load %arg1[%c0, %c0_0] : memref<288x32xf32, #tpu.memory_space<vmem>>, vector<288x32xf32>
    %1 = arith.truncf %0 : vector<288x32xf32> to vector<288x32xbf16>
    %c0_1 = arith.constant 0 : index
    %c0_2 = arith.constant 0 : index
    %2 = vector.load %arg2[%c0_1, %c0_2] : memref<32x64xbf16, #tpu.memory_space<vmem>>, vector<32x64xbf16>
    %cst = arith.constant dense<0.000000e+00> : vector<288x64xf32>
    %3 = tpu.matmul %1, %2, %cst {dimension_numbers = #tpu.dot_dimension_numbers<[1], [0], [0], [1], [0, 0, 1, 1], [], []>} : vector<288x32xbf16>, vector<32x64xbf16>, vector<288x64xf32> -> vector<288x64xf32>
    %c0_3 = arith.constant 0 : index
    %c0_4 = arith.constant 0 : index
    %4 = vector.load %arg3[%c0_3, %c0_4] : memref<1x64xf32, #tpu.memory_space<vmem>>, vector<1x64xf32>
    %5 = vector.broadcast %4 : vector<1x64xf32> to vector<288x64xf32>
    %6 = arith.addf %3, %5 : vector<288x64xf32>
    %cst_5 = arith.constant 0.000000e+00 : f32
    %7 = vector.broadcast %cst_5 : f32 to vector<288x64xf32>
    %8 = arith.maximumf %6, %7 : vector<288x64xf32>
    %9 = arith.truncf %8 : vector<288x64xf32> to vector<288x64xbf16>
    %c0_6 = arith.constant 0 : index
    %c0_7 = arith.constant 0 : index
    %10 = vector.load %arg4[%c0_6, %c0_7] : memref<64x48xbf16, #tpu.memory_space<vmem>>, vector<64x48xbf16>
    %cst_8 = arith.constant dense<0.000000e+00> : vector<288x48xf32>
    %11 = tpu.matmul %9, %10, %cst_8 {dimension_numbers = #tpu.dot_dimension_numbers<[1], [0], [0], [1], [0, 0, 1, 1], [], []>} : vector<288x64xbf16>, vector<64x48xbf16>, vector<288x48xf32> -> vector<288x48xf32>
    %c0_9 = arith.constant 0 : index
    %c0_10 = arith.constant 0 : index
    %12 = vector.load %arg5[%c0_9, %c0_10] : memref<1x48xf32, #tpu.memory_space<vmem>>, vector<1x48xf32>
    %13 = vector.broadcast %12 : vector<1x48xf32> to vector<288x48xf32>
    %14 = arith.addf %11, %13 : vector<288x48xf32>
    %cst_11 = arith.constant 0.000000e+00 : f32
    %15 = vector.broadcast %cst_11 : f32 to vector<288x48xf32>
    %16 = arith.maximumf %14, %15 : vector<288x48xf32>
    %17 = arith.truncf %16 : vector<288x48xf32> to vector<288x48xbf16>
    %c0_12 = arith.constant 0 : index
    %c0_13 = arith.constant 0 : index
    %18 = vector.load %arg6[%c0_12, %c0_13] : memref<48x128xbf16, #tpu.memory_space<vmem>>, vector<48x128xbf16>
    %cst_14 = arith.constant dense<0.000000e+00> : vector<288x128xf32>
    %19 = tpu.matmul %17, %18, %cst_14 {dimension_numbers = #tpu.dot_dimension_numbers<[1], [0], [0], [1], [0, 0, 1, 1], [], []>} : vector<288x48xbf16>, vector<48x128xbf16>, vector<288x128xf32> -> vector<288x128xf32>
    %c0_15 = arith.constant 0 : index
    %c0_16 = arith.constant 0 : index
    %20 = vector.load %arg7[%c0_15, %c0_16] : memref<1x128xf32, #tpu.memory_space<vmem>>, vector<1x128xf32>
    %21 = vector.broadcast %20 : vector<1x128xf32> to vector<288x128xf32>
    %22 = arith.addf %19, %21 : vector<288x128xf32>
    %c0_17 = arith.constant 0 : index
    %c0_18 = arith.constant 0 : index
    %23 = vector.load %arg8[%c0_17, %c0_18] : memref<288x128xf32, #tpu.memory_space<vmem>>, vector<288x128xf32>
    tpu.vector_store %arg8[%c0_17, %c0_18], %22 {strides = array<i32>} : memref<288x128xf32, #tpu.memory_space<vmem>>, vector<288x128xf32>,
    return
  }
  func.func @transform_0(%arg0: i32) -> (i32, i32) {
    %c0_i32 = arith.constant 0 : i32
    %c0_i32_0 = arith.constant 0 : i32
    return %arg0, %c0_i32 : i32, i32
  }
  func.func @transform_1(%arg0: i32) -> (i32, i32) {
    %c0_i32 = arith.constant 0 : i32
    %c0_i32_0 = arith.constant 0 : i32
    %c0_i32_1 = arith.constant 0 : i32
    return %c0_i32, %c0_i32_0 : i32, i32
  }
  func.func @transform_2(%arg0: i32) -> (i32, i32) {
    %c0_i32 = arith.constant 0 : i32
    %c0_i32_0 = arith.constant 0 : i32
    %c0_i32_1 = arith.constant 0 : i32
    return %c0_i32, %c0_i32_0 : i32, i32
  }
  func.func @transform_3(%arg0: i32) -> (i32, i32) {
    %c0_i32 = arith.constant 0 : i32
    %c0_i32_0 = arith.constant 0 : i32
    %c0_i32_1 = arith.constant 0 : i32
    return %c0_i32, %c0_i32_0 : i32, i32
  }
  func.func @transform_4(%arg0: i32) -> (i32, i32) {
    %c0_i32 = arith.constant 0 : i32
    %c0_i32_0 = arith.constant 0 : i32
    %c0_i32_1 = arith.constant 0 : i32
    return %c0_i32, %c0_i32_0 : i32, i32
  }
  func.func @transform_5(%arg0: i32) -> (i32, i32) {
    %c0_i32 = arith.constant 0 : i32
    %c0_i32_0 = arith.constant 0 : i32
    %c0_i32_1 = arith.constant 0 : i32
    return %c0_i32, %c0_i32_0 : i32, i32
  }
  func.func @transform_6(%arg0: i32) -> (i32, i32) {
    %c0_i32 = arith.constant 0 : i32
    %c0_i32_0 = arith.constant 0 : i32
    %c0_i32_1 = arith.constant 0 : i32
    return %c0_i32, %c0_i32_0 : i32, i32
  }
  func.func @transform_7(%arg0: i32) -> (i32, i32) {
    %c0_i32 = arith.constant 0 : i32
    %c0_i32_0 = arith.constant 0 : i32
    return %arg0, %c0_i32 : i32, i32
  }
}

</mosaic_0001>

<bundles_post_ra>
// kernel: modifier_forward.1
= control target key start
LH: loop header
LB: loop body
LE: loop exit
PB: predicated region body
PF: predicated region fallthrough
CT: control target
= control target key end

     0   :  { %s1736_s24 = smov 0   ;;  %s1738_s25 = smov 0   ;;  %s2196_s0 = inlined_call_operand.vmem [shape: f32[300,32], index: 0, kind: input, shape index: {}]   ;;  %s2197_s1 = inlined_call_operand.vmem [shape: bf16[32,64], index: 1, kind: input, shape index: {}]   ;;  %s2198_s2 = inlined_call_operand.vmem [shape: f32[1,64], index: 2, kind: input, shape index: {}]   ;;  %s2199_s3 = inlined_call_operand.vmem [shape: bf16[64,48], index: 3, kind: input, shape index: {}]   ;;  %s2200_s4 = inlined_call_operand.vmem [shape: f32[1,48], index: 4, kind: input, shape index: {}]   ;;  %s2201_s5 = inlined_call_operand.vmem [shape: bf16[48,128], index: 5, kind: input, shape index: {}]   ;;  %s2202_s6 = inlined_call_operand.vmem [shape: f32[1,128], index: 6, kind: input, shape index: {}]   ;;  %s2203_s7 = inlined_call_operand.vmem [shape: f32[300,128], index: 7, kind: output, shape index: {}]  }
   0x1   :  { %s1740_s26 = smov 0  }
   0x2 LB: > { %s1749_s27 = sadd.s32 4294967295, %s1662_s26   ;;  %s1751_s28 = sadd.s32 1, %s1662_s26   ;;  %s1662_s26 = sphi %s1740_s26, %s2212_s26   ;;  %s1658_s25 = sphi %s1738_s25, %s2211_s25   ;;  %s1654_s24 = sphi %s1736_s24, %s2210_s24  }
   0x3   : > { %s173_s29 = ssub.s32 %s1662_s26, %s1751_s28  ;;  %s176_s30 = sadd.s32 1, %s1658_s25 }
   0x4   : > { %p174_p0 = scmp.eq.s32.totalorder %s173_s29, 0  ;;  %p186_p1 = scmp.ne.s32.totalorder %s1658_s25, %s1654_s24 }
   0x5   : > { %p187_p2 = scmp.eq.s32.totalorder %s1749_s27, 1  ;;  %p1388_p3 = scmp.ge.s32.totalorder %s1662_s26, 1 }
   0x6   : > { %s1759_s8 = scalar_select %p174_p0, %s1658_s25, %s176_s30  }
   0x7   : > { %p1761_p4 = por %p187_p2, %p186_p1  ;;  %p246_p5 = scmp.lt.s32.totalorder %s1662_s26, 3 }
   0x9   : > { %p247_p6 = pnand %p1388_p3, %p246_p5 }
   0xa   : > { %s1769_s12 = smul.u32 (!%p247_p6), 36, %s1749_s27  ;;  %s278_s22 = sand.u32 (!%p247_p6), 1, %s1654_s24  }
   0xb   : > { %250 = sbr.rel (%p247_p6) target bundleno = 719 (0x2cf), region = 48 }
   0xc   : > { %p286_p7 = scmp.lt.s32.totalorder (!%p247_p6), %s1769_s12, 37  ;;  %s1516_s23 = smul.u32 (!%p247_p6), 288, %s278_s22 }
   0xe   : > { %s1962_s24 = scalar_lea.vmem (!%p247_p6), [#allocation2], %s1516_s23  }
  0x10   : > { %v1496_v0 = vld [vmem:[%s2197_s1 + $0x8] sm:$0xff]  ;;  %v1495_v1 = vld [vmem:[%s2197_s1] sm:$0xff]  ;;  %s287_s15 = scalar_select %p286_p7, %s1769_s12, 37  ;;  %vm375_vm0 = vcmask 261120   ;;  %v1500_v25 = vld [vmem:[%s2199_s3 + $0x18] sm:$0xff]  ;;  %vm619_vm1 = vcmask 523264  }
  0x11   : > { %436 = vmatpush.bf16.msra.mxu0 %v1496_v0  ;;  %1507 = vmatpush.bf16.msra.mxu3 %v1496_v0  ;;  %v1499_v27 = vld [vmem:[%s2199_s3 + $0x10] sm:$0xff]  ;;  %v1498_v28 = vld [vmem:[%s2199_s3 + $0x8] sm:$0xff]  ;;  %v1497_v29 = vld [vmem:[%s2199_s3] sm:$0xff]  ;;  %vm855_vm2 = vcmask 392192   ;;  %s1053_s30 = ssub.s32 (%p1761_p4), 38, %s1769_s12  ;;  %s1504_s10 = smul.u32 (%p1761_p4), 288, %s1749_s27 }
  0x12   : > { %s1389_s16 = sshll.u32 %s287_s15, 3  ;;  %678 = vmatpush.bf16.msra.mxu1 %v1500_v25  ;;  %v1831_v43 = vld [vmem:[%s2198_s2] ss:$0 sm:$0xff]  ;;  %p1054_p8 = scmp.lt.s32.totalorder (%p1761_p4), %s1053_s30, 36 }
  0x13   : > { %s1779_s19 = scalar_lea.vmem %s2196_s0, %s1389_s16  ;;  %s2061_s14 = scalar_lea.vmem (%p1761_p4), %s2203_s7, %s1504_s10  }
  0x14   : > { %v301_v2 = vld [vmem:[%s1779_s19] sm:$0xff]  ;;  %v302_v3 = vld [vmem:[%s1779_s19 + $0x8] sm:$0xff]  ;;  %v303_v5 = vld [vmem:[%s1779_s19 + $0x10] sm:$0xff] }
  0x15   : > { %437 = vmatpush.bf16.msra.mxu0 %v1495_v1  ;;  %1508 = vmatpush.bf16.msra.mxu3 %v1495_v1  ;;  %v337_v4 = vpack.c.bf16 %v302_v3, %v301_v2  ;;  %v304_v6 = vld [vmem:[%s1779_s19 + $0x18] sm:$0xff]  ;;  %v305_v8 = vld [vmem:[%s1779_s19 + $0x20] sm:$0xff]  ;;  %v306_v9 = vld [vmem:[%s1779_s19 + $0x28] sm:$0xff] }
  0x16   : > { %v338_v7 = vpack.c.bf16 %v304_v6, %v303_v5  ;;  %v339_v10 = vpack.c.bf16 %v306_v9, %v305_v8  ;;  %v307_v11 = vld [vmem:[%s1779_s19 + $0x30] sm:$0xff]  ;;  %v308_v12 = vld [vmem:[%s1779_s19 + $0x38] sm:$0xff]  ;;  %v309_v14 = vld [vmem:[%s1779_s19 + $0x40] sm:$0xff]  ;;  %679 = vmatpush.bf16.msra.mxu1 %v1499_v27 }
  0x17   : > { %v340_v13 = vpack.c.bf16 %v308_v12, %v307_v11  ;;  %v310_v15 = vld [vmem:[%s1779_s19 + $0x48] sm:$0xff]  ;;  %v311_v17 = vld [vmem:[%s1779_s19 + $0x50] sm:$0xff]  ;;  %v312_v18 = vld [vmem:[%s1779_s19 + $0x58] sm:$0xff] }
  0x18   : > { %1398 = vmatmul.msk.bf16.vlgmr.msra.gmra.mxu0 %vm375_vm0, %v337_v4  ;;  %v341_v16 = vpack.c.bf16 %v310_v15, %v309_v14  ;;  %v342_v19 = vpack.c.bf16 %v312_v18, %v311_v17  ;;  %v329_v20 = vld [vmem:[%s1779_s19 + $0xe0] sm:$0xff]  ;;  %v330_v21 = vld [vmem:[%s1779_s19 + $0xe8] sm:$0xff]  ;;  %v331_v30 = vld [vmem:[%s1779_s19 + $0xf0] sm:$0xff] }
  0x19   : > { %v351_v22 = vpack.c.bf16 %v330_v21, %v329_v20  ;;  %v313_v23 = vld [vmem:[%s1779_s19 + $0x60] sm:$0xff]  ;;  %v314_v24 = vld [vmem:[%s1779_s19 + $0x68] sm:$0xff]  ;;  %1509 = vmatpush.bf16.msrb.mxu3 %v1500_v25  ;;  %v332_v31 = vld [vmem:[%s1779_s19 + $0xf8] sm:$0xff] }
  0x1a   : > { %v343_v26 = vpack.c.bf16 %v314_v24, %v313_v23  ;;  %680 = vmatpush.bf16.msra.mxu1 %v1498_v28  ;;  %v315_v32 = vld [vmem:[%s1779_s19 + $0x70] sm:$0xff]  ;;  %v316_v33 = vld [vmem:[%s1779_s19 + $0x78] sm:$0xff]  ;;  %v352_v34 = vpack.c.bf16 %v332_v31, %v331_v30  ;;  %v333_v36 = vld [vmem:[%s1779_s19 + $0x100] sm:$0xff] }
  0x1b   : > { %1412 = vmatmul.msk.bf16.vlgmr.msra.gmra.mxu3 %vm375_vm0, %v351_v22  ;;  %v344_v35 = vpack.c.bf16 %v316_v33, %v315_v32  ;;  %v334_v37 = vld [vmem:[%s1779_s19 + $0x108] sm:$0xff]  ;;  %v317_v38 = vld [vmem:[%s1779_s19 + $0x80] sm:$0xff]  ;;  %v319_v49 = vld [vmem:[%s1779_s19 + $0x90] sm:$0xff] }
  0x1c   : > { %v318_v39 = vld [vmem:[%s1779_s19 + $0x88] sm:$0xff]  ;;  %v353_v40 = vpack.c.bf16 %v334_v37, %v333_v36  ;;  %v320_v50 = vld [vmem:[%s1779_s19 + $0x98] sm:$0xff]  ;;  %v335_v51 = vld [vmem:[%s1779_s19 + $0x110] sm:$0xff] }
  0x1d   : > { %1510 = vmatpush.bf16.msrb.mxu3 %v1499_v27  ;;  %v345_v41 = vpack.c.bf16 %v318_v39, %v317_v38  ;;  %v336_v52 = vld [vmem:[%s1779_s19 + $0x118] sm:$0xff]  ;;  %v346_v55 = vpack.c.bf16 %v320_v50, %v319_v49  ;;  %v321_v62 = vld [vmem:[%s1779_s19 + $0xa0] sm:$0xff]  ;;  %v322_v63 = vld [vmem:[%s1779_s19 + $0xa8] sm:$0xff] }
  0x1e   : > { %681 = vmatpush.bf16.msra.mxu1 %v1497_v29  ;;  %v354_v54 = vpack.c.bf16 %v336_v52, %v335_v51  ;;  %v347_v1 = vpack.c.bf16 %v322_v63, %v321_v62  ;;  %v323_v8 = vld [vmem:[%s1779_s19 + $0xb0] sm:$0xff]  ;;  %v324_v9 = vld [vmem:[%s1779_s19 + $0xb8] sm:$0xff]  ;;  %v325_v18 = vld [vmem:[%s1779_s19 + $0xc0] sm:$0xff] }
  0x1f   : > { %v348_v11 = vpack.c.bf16 %v324_v9, %v323_v8 }
  0x21   : > { %1511 = vmatpush.bf16.msrb.mxu3 %v1498_v28  ;;  %v327_v28 = vld [vmem:[%s1779_s19 + $0xd0] sm:$0xff] }
  0x25   : > { %1512 = vmatpush.bf16.msrb.mxu3 %v1497_v29  ;;  %v328_v29 = vld [vmem:[%s1779_s19 + $0xd8] sm:$0xff] }
  0x26   : > { %v350_v31 = vpack.c.bf16 %v328_v29, %v327_v28 }
  0x28   : > { %1399 = vmatmul.msk.bf16.gmra.mxu0 %vm375_vm0, %v338_v7 }
  0x2b   : > { %1413 = vmatmul.msk.bf16.gmra.mxu3 %vm375_vm0, %v352_v34 }
  0x38   : > { %1400 = vmatmul.msk.bf16.gmra.mxu0 %vm375_vm0, %v339_v10 }
  0x3b   : > { %1414 = vmatmul.msk.bf16.gmra.mxu3 %vm375_vm0, %v353_v40 }
  0x48   : > { %1401 = vmatmul.msk.bf16.gmra.mxu0 %vm375_vm0, %v340_v13 }
  0x4b   : > { %1415 = vmatmul.msk.bf16.gmra.mxu3 %vm375_vm0, %v354_v54 }
  0x58   : > { %1402 = vmatmul.msk.bf16.gmra.mxu0 %vm375_vm0, %v341_v16 }
  0x68   : > { %1403 = vmatmul.msk.bf16.gmra.mxu0 %vm375_vm0, %v342_v19  ;;  %v326_v19 = vld [vmem:[%s1779_s19 + $0xc8] sm:$0xff] }
  0x69   : > { %v349_v21 = vpack.c.bf16 %v326_v19, %v325_v18 }
  0x78   : > { %1404 = vmatmul.msk.bf16.gmra.mxu0 %vm375_vm0, %v343_v26 }
  0x88   : > { %1405 = vmatmul.msk.bf16.gmra.mxu0 %vm375_vm0, %v344_v35 }
  0x95   : > { %v439_v42 = vpop.f32.mrf.mxu0 }
  0x96   : > { %v440_v44 = vadd.f32 %v1831_v43, %v439_v42 }
  0x98   : > { %1406 = vmatmul.msk.bf16.gmra.mxu0 %vm375_vm0, %v345_v41  ;;  %v529_v47 = vmax.f32 %v440_v44, 0.0 }
  0x9d   : > { %v441_v45 = vpop.f32.mrf.mxu0 }
  0x9e   : > { %v442_v46 = vadd.f32 %v1831_v43, %v441_v45  ;;  %v509_v40 = vpop.f32.mrf.mxu3 }
  0x9f   : > { %v510_v42 = vadd.f32 %v1831_v43, %v509_v40 }
  0xa0   : > { %v530_v48 = vmax.f32 %v442_v46, 0.0 }
  0xa1   : > { %v557_v49 = vmax.f32 %v510_v42, 0.0 }
  0xa2   : > { %v565_v53 = vpack.c.bf16 %v530_v48, %v529_v47 }
  0xa4   : > { %1432 = vmatmul.msk.bf16.vlgmr.msra.gmra.mxu1 %vm619_vm1, %v565_v53  ;;  %v1503_v53 = vld [vmem:[%s2201_s5 + $0x10] sm:$0xff] }
  0xa5   : > { %v444_v56 = vpop.f32.mrf.mxu0  ;;  %915 = vmatpush.bf16.msra.mxu2 %v1503_v53  ;;  %1513 = vmatpush.bf16.msra.mxu3 %v1503_v53 }
  0xa6   : > { %v445_v57 = vadd.f32 %v1831_v43, %v444_v56  ;;  %v511_v46 = vpop.f32.mrf.mxu3 }
  0xa7   : > { %v512_v50 = vadd.f32 %v1831_v43, %v511_v46 }
  0xa8   : > { %1407 = vmatmul.msk.bf16.gmra.mxu0 %vm375_vm0, %v346_v55  ;;  %v531_v60 = vmax.f32 %v445_v57, 0.0  ;;  %v1502_v57 = vld [vmem:[%s2201_s5 + $0x8] sm:$0xff] }
  0xa9   : > { %v558_v52 = vmax.f32 %v512_v50, 0.0  ;;  %916 = vmatpush.bf16.msra.mxu2 %v1502_v57  ;;  %1514 = vmatpush.bf16.msra.mxu3 %v1502_v57 }
  0xab   : > { %v579_v54 = vpack.c.bf16 %v558_v52, %v557_v49 }
  0xad   : > { %v446_v58 = vpop.f32.mrf.mxu0  ;;  %1446 = vmatmul.msk.bf16.vlgmr.msrb.gmra.mxu3 %vm619_vm1, %v579_v54 }
  0xae   : > { %v447_v59 = vadd.f32 %v1831_v43, %v446_v58  ;;  %v514_v56 = vpop.f32.mrf.mxu3  ;;  %v1501_v58 = vld [vmem:[%s2201_s5] sm:$0xff] }
  0xaf   : > { %917 = vmatpush.bf16.msra.mxu2 %v1501_v58  ;;  %1515 = vmatpush.bf16.msra.mxu3 %v1501_v58 }
  0xb0   : > { %v532_v61 = vmax.f32 %v447_v59, 0.0 }
  0xb2   : > { %v566_v0 = vpack.c.bf16 %v532_v61, %v531_v60  ;;  %v515_v60 = vadd.f32 %v1831_v43, %v514_v56 }
  0xb4   : > { %1433 = vmatmul.msk.bf16.gmra.mxu1 %vm619_vm1, %v566_v0 }
  0xb5   : > { %v449_v2 = vpop.f32.mrf.mxu0 }
  0xb6   : > { %v450_v3 = vadd.f32 %v1831_v43, %v449_v2  ;;  %v516_v63 = vpop.f32.mrf.mxu3  ;;  %v559_v2 = vmax.f32 %v515_v60, 0.0 }
  0xb8   : > { %1408 = vmatmul.msk.bf16.gmra.mxu0 %vm375_vm0, %v347_v1  ;;  %v533_v6 = vmax.f32 %v450_v3, 0.0  ;;  %v517_v3 = vadd.f32 %v1831_v43, %v516_v63 }
  0xbd   : > { %v451_v4 = vpop.f32.mrf.mxu0 }
  0xbe   : > { %v452_v5 = vadd.f32 %v1831_v43, %v451_v4  ;;  %v519_v8 = vpop.f32.mrf.mxu3 }
  0xc0   : > { %v534_v7 = vmax.f32 %v452_v5, 0.0  ;;  %v560_v5 = vmax.f32 %v517_v3, 0.0 }
  0xc2   : > { %v567_v10 = vpack.c.bf16 %v534_v7, %v533_v6  ;;  %v580_v6 = vpack.c.bf16 %v560_v5, %v559_v2 }
  0xc4   : > { %1434 = vmatmul.msk.bf16.gmra.mxu1 %vm619_vm1, %v567_v10  ;;  %1447 = vmatmul.msk.bf16.gmra.mxu3 %vm619_vm1, %v580_v6  ;;  %v520_v10 = vadd.f32 %v1831_v43, %v519_v8 }
  0xc5   : > { %v454_v12 = vpop.f32.mrf.mxu0 }
  0xc6   : > { %v455_v13 = vadd.f32 %v1831_v43, %v454_v12 }
  0xc8   : > { %1409 = vmatmul.msk.bf16.gmra.mxu0 %vm375_vm0, %v348_v11  ;;  %v535_v16 = vmax.f32 %v455_v13, 0.0  ;;  %v521_v13 = vpop.f32.mrf.mxu3 }
  0xcd   : > { %v456_v14 = vpop.f32.mrf.mxu0 }
  0xce   : > { %v457_v15 = vadd.f32 %v1831_v43, %v456_v14 }
  0xd0   : > { %v536_v17 = vmax.f32 %v457_v15, 0.0 }
  0xd2   : > { %v568_v20 = vpack.c.bf16 %v536_v17, %v535_v16  ;;  %v561_v16 = vmax.f32 %v520_v10, 0.0  ;;  %v522_v17 = vadd.f32 %v1831_v43, %v521_v13 }
  0xd4   : > { %1435 = vmatmul.msk.bf16.gmra.mxu1 %vm619_vm1, %v568_v20  ;;  %v562_v20 = vmax.f32 %v522_v17, 0.0 }
  0xd5   : > { %v459_v22 = vpop.f32.mrf.mxu0 }
  0xd6   : > { %v460_v23 = vadd.f32 %v1831_v43, %v459_v22  ;;  %v581_v22 = vpack.c.bf16 %v562_v20, %v561_v16 }
  0xd8   : > { %1410 = vmatmul.msk.bf16.gmra.mxu0 %vm375_vm0, %v349_v21  ;;  %v537_v26 = vmax.f32 %v460_v23, 0.0  ;;  %v1898_v21 = vld [vmem:[%s2200_s4] ss:$0 sm:$0xff]  ;;  %1448 = vmatmul.msk.bf16.gmra.mxu3 %vm619_vm1, %v581_v22 }
  0xdd   : > { %v461_v24 = vpop.f32.mrf.mxu0 }
  0xde   : > { %v462_v25 = vadd.f32 %v1831_v43, %v461_v24  ;;  %v524_v24 = vpop.f32.mrf.mxu3 }
  0xe0   : > { %v538_v27 = vmax.f32 %v462_v25, 0.0 }
  0xe2   : > { %v569_v30 = vpack.c.bf16 %v538_v27, %v537_v26 }
  0xe4   : > { %1436 = vmatmul.msk.bf16.gmra.mxu1 %vm619_vm1, %v569_v30 }
  0xe5   : > { %v464_v32 = vpop.f32.mrf.mxu0 }
  0xe6   : > { %v465_v33 = vadd.f32 %v1831_v43, %v464_v32 }
  0xe8   : > { %1411 = vmatmul.msk.bf16.gmra.mxu0 %vm375_vm0, %v350_v31  ;;  %v539_v36 = vmax.f32 %v465_v33, 0.0  ;;  %v525_v31 = vadd.f32 %v1831_v43, %v524_v24 }
  0xed   : > { %v466_v34 = vpop.f32.mrf.mxu0 }
  0xee   : > { %v467_v35 = vadd.f32 %v1831_v43, %v466_v34 }
  0xf0   : > { %v540_v37 = vmax.f32 %v467_v35, 0.0  ;;  %v526_v35 = vpop.f32.mrf.mxu3 }
  0xf2   : > { %v570_v38 = vpack.c.bf16 %v540_v37, %v539_v36 }
  0xf4   : > { %1437 = vmatmul.msk.bf16.gmra.mxu1 %vm619_vm1, %v570_v38  ;;  %v563_v38 = vmax.f32 %v525_v31, 0.0 }
  0xf5   : > { %v469_v39 = vpop.f32.mrf.mxu0 }
  0xf6   : > { %v470_v41 = vadd.f32 %v1831_v43, %v469_v39  ;;  %v527_v39 = vadd.f32 %v1831_v43, %v526_v35 }
  0xf8   : > { %v541_v47 = vmax.f32 %v470_v41, 0.0  ;;  %v564_v42 = vmax.f32 %v527_v39, 0.0 }
  0xfd   : > { %v471_v44 = vpop.f32.mrf.mxu0 }
  0xfe   : > { %v472_v45 = vadd.f32 %v1831_v43, %v471_v44  ;;  %v582_v44 = vpack.c.bf16 %v564_v42, %v563_v38 }
 0x100   : > { %v542_v48 = vmax.f32 %v472_v45, 0.0  ;;  %1449 = vmatmul.msk.bf16.gmra.mxu3 %vm619_vm1, %v582_v44 }
 0x102   : > { %v571_v51 = vpack.c.bf16 %v542_v48, %v541_v47 }
 0x104   : > { %1438 = vmatmul.msk.bf16.gmra.mxu1 %vm619_vm1, %v571_v51 }
 0x105   : > { %v474_v55 = vpop.f32.mrf.mxu0 }
 0x106   : > { %v475_v59 = vadd.f32 %v1831_v43, %v474_v55 }
 0x108   : > { %v543_v0 = vmax.f32 %v475_v59, 0.0 }
 0x10d   : > { %v476_v61 = vpop.f32.mrf.mxu0 }
 0x10e   : > { %v477_v62 = vadd.f32 %v1831_v43, %v476_v61 }
 0x110   : > { %v544_v1 = vmax.f32 %v477_v62, 0.0 }
 0x112   : > { %v572_v4 = vpack.c.bf16 %v544_v1, %v543_v0 }
 0x114   : > { %1439 = vmatmul.msk.bf16.gmra.mxu1 %vm619_vm1, %v572_v4 }
 0x115   : > { %v479_v7 = vpop.f32.mrf.mxu0 }
 0x116   : > { %v480_v9 = vadd.f32 %v1831_v43, %v479_v7 }
 0x118   : > { %v545_v14 = vmax.f32 %v480_v9, 0.0 }
 0x11d   : > { %v481_v11 = vpop.f32.mrf.mxu0 }
 0x11e   : > { %v482_v12 = vadd.f32 %v1831_v43, %v481_v11 }
 0x120   : > { %v546_v15 = vmax.f32 %v482_v12, 0.0 }
 0x121   : > { %v683_v18 = vpop.f32.mrf.mxu1 }
 0x122   : > { %v573_v19 = vpack.c.bf16 %v546_v15, %v545_v14  ;;  %v684_v25 = vadd.f32 %v1898_v21, %v683_v18 }
 0x124   : > { %1440 = vmatmul.msk.bf16.gmra.mxu1 %vm619_vm1, %v573_v19  ;;  %v773_v28 = vmax.f32 %v684_v25, 0.0 }
 0x125   : > { %v484_v23 = vpop.f32.mrf.mxu0 }
 0x126   : > { %v485_v29 = vadd.f32 %v1831_v43, %v484_v23 }
 0x128   : > { %v547_v36 = vmax.f32 %v485_v29, 0.0 }
 0x129   : > { %v685_v26 = vpop.f32.mrf.mxu1 }
 0x12a   : > { %v686_v27 = vadd.f32 %v1898_v21, %v685_v26 }
 0x12c   : > { %v774_v30 = vmax.f32 %v686_v27, 0.0 }
 0x12d   : > { %v486_v32 = vpop.f32.mrf.mxu0 }
 0x12e   : > { %v487_v33 = vadd.f32 %v1831_v43, %v486_v32  ;;  %v809_v34 = vpack.c.bf16 %v774_v30, %v773_v28 }
 0x130   : > { %v548_v37 = vmax.f32 %v487_v33, 0.0  ;;  %1462 = vmatmul.msk.bf16.vlgmr.msra.gmra.mxu2 %vm855_vm2, %v809_v34 }
 0x131   : > { %v688_v40 = vpop.f32.mrf.mxu1 }
 0x132   : > { %v574_v41 = vpack.c.bf16 %v548_v37, %v547_v36  ;;  %v689_v46 = vadd.f32 %v1898_v21, %v688_v40 }
 0x134   : > { %1441 = vmatmul.msk.bf16.gmra.mxu1 %vm619_vm1, %v574_v41  ;;  %v775_v49 = vmax.f32 %v689_v46, 0.0 }
 0x135   : > { %v489_v45 = vpop.f32.mrf.mxu0 }
 0x136   : > { %v490_v50 = vadd.f32 %v1831_v43, %v489_v45 }
 0x138   : > { %v549_v55 = vmax.f32 %v490_v50, 0.0 }
 0x139   : > { %v690_v47 = vpop.f32.mrf.mxu1 }
 0x13a   : > { %v691_v48 = vadd.f32 %v1898_v21, %v690_v47  ;;  %v753_v47 = vpop.f32.mrf.mxu3 }
 0x13c   : > { %v776_v51 = vmax.f32 %v691_v48, 0.0 }
 0x13d   : > { %v491_v52 = vpop.f32.mrf.mxu0 }
 0x13e   : > { %v492_v53 = vadd.f32 %v1831_v43, %v491_v52  ;;  %v810_v54 = vpack.c.bf16 %v776_v51, %v775_v49  ;;  %v754_v52 = vadd.f32 %v1898_v21, %v753_v47 }
 0x140   : > { %v550_v56 = vmax.f32 %v492_v53, 0.0  ;;  %1463 = vmatmul.msk.bf16.gmra.mxu2 %vm855_vm2, %v810_v54 }
 0x141   : > { %v693_v57 = vpop.f32.mrf.mxu1 }
 0x142   : > { %v575_v58 = vpack.c.bf16 %v550_v56, %v549_v55  ;;  %v694_v60 = vadd.f32 %v1898_v21, %v693_v57  ;;  %v755_v54 = vpop.f32.mrf.mxu3  ;;  %v801_v55 = vmax.f32 %v754_v52, 0.0 }
 0x143   : > { %v756_v56 = vadd.f32 %v1898_v21, %v755_v54 }
 0x144   : > { %1442 = vmatmul.msk.bf16.gmra.mxu1 %vm619_vm1, %v575_v58  ;;  %v777_v63 = vmax.f32 %v694_v60, 0.0 }
 0x145   : > { %v494_v59 = vpop.f32.mrf.mxu0  ;;  %v802_v57 = vmax.f32 %v756_v56, 0.0 }
 0x146   : > { %v495_v0 = vadd.f32 %v1831_v43, %v494_v59 }
 0x147   : > { %v823_v58 = vpack.c.bf16 %v802_v57, %v801_v55 }
 0x148   : > { %v551_v5 = vmax.f32 %v495_v0, 0.0 }
 0x149   : > { %v695_v61 = vpop.f32.mrf.mxu1  ;;  %1476 = vmatmul.msk.bf16.vlgmr.msra.gmra.mxu3 %vm855_vm2, %v823_v58 }
 0x14a   : > { %v696_v62 = vadd.f32 %v1898_v21, %v695_v61  ;;  %v758_v61 = vpop.f32.mrf.mxu3 }
 0x14c   : > { %v778_v1 = vmax.f32 %v696_v62, 0.0 }
 0x14d   : > { %v496_v2 = vpop.f32.mrf.mxu0 }
 0x14e   : > { %v811_v3 = vpack.c.bf16 %v778_v1, %v777_v63  ;;  %v497_v4 = vadd.f32 %v1831_v43, %v496_v2  ;;  %v759_v2 = vadd.f32 %v1898_v21, %v758_v61 }
 0x150   : > { %v552_v6 = vmax.f32 %v497_v4, 0.0  ;;  %1464 = vmatmul.msk.bf16.gmra.mxu2 %vm855_vm2, %v811_v3 }
 0x151   : > { %v698_v7 = vpop.f32.mrf.mxu1 }
 0x152   : > { %v576_v8 = vpack.c.bf16 %v552_v6, %v551_v5  ;;  %v699_v10 = vadd.f32 %v1898_v21, %v698_v7  ;;  %v760_v4 = vpop.f32.mrf.mxu3  ;;  %v803_v5 = vmax.f32 %v759_v2, 0.0 }
 0x153   : > { %v761_v6 = vadd.f32 %v1898_v21, %v760_v4 }
 0x154   : > { %1443 = vmatmul.msk.bf16.gmra.mxu1 %vm619_vm1, %v576_v8  ;;  %v779_v13 = vmax.f32 %v699_v10, 0.0 }
 0x155   : > { %v499_v9 = vpop.f32.mrf.mxu0  ;;  %v804_v7 = vmax.f32 %v761_v6, 0.0 }
 0x156   : > { %v500_v14 = vadd.f32 %v1831_v43, %v499_v9 }
 0x157   : > { %v824_v8 = vpack.c.bf16 %v804_v7, %v803_v5 }
 0x158   : > { %v553_v19 = vmax.f32 %v500_v14, 0.0 }
 0x159   : > { %v700_v11 = vpop.f32.mrf.mxu1  ;;  %1477 = vmatmul.msk.bf16.gmra.mxu3 %vm855_vm2, %v824_v8 }
 0x15a   : > { %v701_v12 = vadd.f32 %v1898_v21, %v700_v11 }
 0x15b   : > { %v763_v11 = vpop.f32.mrf.mxu3 }
 0x15c   : > { %v780_v15 = vmax.f32 %v701_v12, 0.0 }
 0x15d   : > { %v501_v16 = vpop.f32.mrf.mxu0 }
 0x15e   : > { %v812_v17 = vpack.c.bf16 %v780_v15, %v779_v13  ;;  %v502_v18 = vadd.f32 %v1831_v43, %v501_v16  ;;  %v764_v16 = vadd.f32 %v1898_v21, %v763_v11 }
 0x160   : > { %v554_v20 = vmax.f32 %v502_v18, 0.0  ;;  %1465 = vmatmul.msk.bf16.gmra.mxu2 %vm855_vm2, %v812_v17  ;;  %v1958_v17 = vld [vmem:[%s2202_s6] ss:$0 sm:$0xff] }
 0x161   : > { %v703_v22 = vpop.f32.mrf.mxu1 }
 0x162   : > { %v577_v23 = vpack.c.bf16 %v554_v20, %v553_v19  ;;  %v704_v25 = vadd.f32 %v1898_v21, %v703_v22  ;;  %v805_v20 = vmax.f32 %v764_v16, 0.0 }
 0x163   : > { %v765_v19 = vpop.f32.mrf.mxu3 }
 0x164   : > { %1444 = vmatmul.msk.bf16.gmra.mxu1 %vm619_vm1, %v577_v23  ;;  %v781_v28 = vmax.f32 %v704_v25, 0.0  ;;  %v766_v22 = vadd.f32 %v1898_v21, %v765_v19 }
 0x165   : > { %v504_v24 = vpop.f32.mrf.mxu0 }
 0x166   : > { %v505_v29 = vadd.f32 %v1831_v43, %v504_v24  ;;  %v806_v25 = vmax.f32 %v766_v22, 0.0 }
 0x168   : > { %v555_v34 = vmax.f32 %v505_v29, 0.0 }
 0x169   : > { %v705_v26 = vpop.f32.mrf.mxu1 }
 0x16a   : > { %v706_v27 = vadd.f32 %v1898_v21, %v705_v26  ;;  %v825_v26 = vpack.c.bf16 %v806_v25, %v805_v20 }
 0x16c   : > { %v782_v30 = vmax.f32 %v706_v27, 0.0  ;;  %1478 = vmatmul.msk.bf16.gmra.mxu3 %vm855_vm2, %v825_v26 }
 0x16d   : > { %v506_v31 = vpop.f32.mrf.mxu0 }
 0x16e   : > { %v813_v32 = vpack.c.bf16 %v782_v30, %v781_v28  ;;  %v507_v33 = vadd.f32 %v1831_v43, %v506_v31 }
 0x170   : > { %v556_v35 = vmax.f32 %v507_v33, 0.0  ;;  %1466 = vmatmul.msk.bf16.gmra.mxu2 %vm855_vm2, %v813_v32 }
 0x171   : > { %v708_v36 = vpop.f32.mrf.mxu1 }
 0x172   : > { %v578_v37 = vpack.c.bf16 %v556_v35, %v555_v34  ;;  %v709_v38 = vadd.f32 %v1898_v21, %v708_v36 }
 0x174   : > { %1445 = vmatmul.msk.bf16.gmra.mxu1 %vm619_vm1, %v578_v37  ;;  %v783_v41 = vmax.f32 %v709_v38, 0.0 }
 0x179   : > { %v710_v39 = vpop.f32.mrf.mxu1 }
 0x17a   : > { %v711_v40 = vadd.f32 %v1898_v21, %v710_v39 }
 0x17c   : > { %v784_v42 = vmax.f32 %v711_v40, 0.0 }
 0x17e   : > { %v814_v44 = vpack.c.bf16 %v784_v42, %v783_v41 }
 0x180   : > { %1467 = vmatmul.msk.bf16.gmra.mxu2 %vm855_vm2, %v814_v44 }
 0x181   : > { %v713_v45 = vpop.f32.mrf.mxu1 }
 0x182   : > { %v714_v43 = vadd.f32 %v1898_v21, %v713_v45 }
 0x183   : > { %v768_v29 = vpop.f32.mrf.mxu3 }
 0x184   : > { %v785_v49 = vmax.f32 %v714_v43, 0.0  ;;  %v769_v36 = vadd.f32 %v1898_v21, %v768_v29 }
 0x186   : > { %v807_v39 = vmax.f32 %v769_v36, 0.0 }
 0x189   : > { %v715_v46 = vpop.f32.mrf.mxu1 }
 0x18a   : > { %v716_v48 = vadd.f32 %v1898_v21, %v715_v46 }
 0x18b   : > { %v770_v38 = vpop.f32.mrf.mxu3 }
 0x18c   : > { %v786_v50 = vmax.f32 %v716_v48, 0.0  ;;  %v771_v40 = vadd.f32 %v1898_v21, %v770_v38 }
 0x18e   : > { %v815_v51 = vpack.c.bf16 %v786_v50, %v785_v49  ;;  %v808_v44 = vmax.f32 %v771_v40, 0.0 }
 0x190   : > { %1468 = vmatmul.msk.bf16.gmra.mxu2 %vm855_vm2, %v815_v51  ;;  %v826_v45 = vpack.c.bf16 %v808_v44, %v807_v39 }
 0x191   : > { %v718_v53 = vpop.f32.mrf.mxu1 }
 0x192   : > { %v719_v59 = vadd.f32 %v1898_v21, %v718_v53  ;;  %1479 = vmatmul.msk.bf16.gmra.mxu3 %vm855_vm2, %v826_v45 }
 0x194   : > { %v787_v63 = vmax.f32 %v719_v59, 0.0 }
 0x199   : > { %v720_v60 = vpop.f32.mrf.mxu1 }
 0x19a   : > { %v721_v62 = vadd.f32 %v1898_v21, %v720_v60 }
 0x19c   : > { %v788_v0 = vmax.f32 %v721_v62, 0.0 }
 0x19e   : > { %v816_v1 = vpack.c.bf16 %v788_v0, %v787_v63 }
 0x1a0   : > { %1469 = vmatmul.msk.bf16.gmra.mxu2 %vm855_vm2, %v816_v1 }
 0x1a1   : > { %v723_v3 = vpop.f32.mrf.mxu1 }
 0x1a2   : > { %v724_v9 = vadd.f32 %v1898_v21, %v723_v3 }
 0x1a4   : > { %v789_v13 = vmax.f32 %v724_v9, 0.0 }
 0x1a9   : > { %v725_v10 = vpop.f32.mrf.mxu1 }
 0x1aa   : > { %v726_v12 = vadd.f32 %v1898_v21, %v725_v10 }
 0x1ac   : > { %v790_v14 = vmax.f32 %v726_v12, 0.0 }
 0x1ae   : > { %v817_v15 = vpack.c.bf16 %v790_v14, %v789_v13 }
 0x1b0   : > { %1470 = vmatmul.msk.bf16.gmra.mxu2 %vm855_vm2, %v817_v15 }
 0x1b1   : > { %v728_v18 = vpop.f32.mrf.mxu1 }
 0x1b2   : > { %v729_v27 = vadd.f32 %v1898_v21, %v728_v18 }
 0x1b3   : > { %v919_v23 = vpop.f32.mrf.mxu2 }
 0x1b4   : > { %v920_v24 = vadd.f32 %v1958_v17, %v919_v23  ;;  %v791_v32 = vmax.f32 %v729_v27, 0.0 }
 0x1b6   : > { %1009 = vst [vmem:[%s1962_s24] sm:$0xff] %v920_v24 }
 0x1b9   : > { %v730_v28 = vpop.f32.mrf.mxu1 }
 0x1ba   : > { %v731_v30 = vadd.f32 %v1898_v21, %v730_v28 }
 0x1bb   : > { %v921_v31 = vpop.f32.mrf.mxu2 }
 0x1bc   : > { %v792_v33 = vmax.f32 %v731_v30, 0.0  ;;  %v922_v34 = vadd.f32 %v1958_v17, %v921_v31 }
 0x1be   : > { %v818_v35 = vpack.c.bf16 %v792_v33, %v791_v32  ;;  %1010 = vst [vmem:[%s1962_s24 + $0x8] sm:$0xff] %v922_v34 }
 0x1c0   : > { %1471 = vmatmul.msk.bf16.gmra.mxu2 %vm855_vm2, %v818_v35 }
 0x1c1   : > { %v733_v37 = vpop.f32.mrf.mxu1 }
 0x1c2   : > { %v734_v43 = vadd.f32 %v1898_v21, %v733_v37 }
 0x1c3   : > { %v924_v41 = vpop.f32.mrf.mxu2 }
 0x1c4   : > { %v925_v42 = vadd.f32 %v1958_v17, %v924_v41  ;;  %v793_v49 = vmax.f32 %v734_v43, 0.0 }
 0x1c6   : > { %1011 = vst [vmem:[%s1962_s24 + $0x10] sm:$0xff] %v925_v42 }
 0x1c9   : > { %v735_v46 = vpop.f32.mrf.mxu1 }
 0x1ca   : > { %v736_v47 = vadd.f32 %v1898_v21, %v735_v46 }
 0x1cb   : > { %v926_v48 = vpop.f32.mrf.mxu2 }
 0x1cc   : > { %v794_v50 = vmax.f32 %v736_v47, 0.0  ;;  %v927_v51 = vadd.f32 %v1958_v17, %v926_v48  ;;  %v989_v30 = vpop.f32.mrf.mxu3 }
 0x1cd   : > { %v990_v32 = vadd.f32 %v1958_v17, %v989_v30 }
 0x1ce   : > { %v819_v52 = vpack.c.bf16 %v794_v50, %v793_v49  ;;  %1012 = vst [vmem:[%s1962_s24 + $0x18] sm:$0xff] %v927_v51 }
 0x1cf   : > { %1037 = vst [vmem:[%s1962_s24 + $0xe0] sm:$0xff] %v990_v32 }
 0x1d0   : > { %1472 = vmatmul.msk.bf16.gmra.mxu2 %vm855_vm2, %v819_v52 }
 0x1d1   : > { %v738_v53 = vpop.f32.mrf.mxu1 }
 0x1d2   : > { %v739_v56 = vadd.f32 %v1898_v21, %v738_v53 }
 0x1d3   : > { %v929_v54 = vpop.f32.mrf.mxu2 }
 0x1d4   : > { %v930_v55 = vadd.f32 %v1958_v17, %v929_v54  ;;  %v795_v60 = vmax.f32 %v739_v56, 0.0  ;;  %v991_v34 = vpop.f32.mrf.mxu3 }
 0x1d5   : > { %v992_v36 = vadd.f32 %v1958_v17, %v991_v34 }
 0x1d6   : > { %1013 = vst [vmem:[%s1962_s24 + $0x20] sm:$0xff] %v930_v55 }
 0x1d7   : > { %1038 = vst [vmem:[%s1962_s24 + $0xe8] sm:$0xff] %v992_v36 }
 0x1d9   : > { %v740_v57 = vpop.f32.mrf.mxu1 }
 0x1da   : > { %v741_v58 = vadd.f32 %v1898_v21, %v740_v57 }
 0x1db   : > { %v931_v59 = vpop.f32.mrf.mxu2 }
 0x1dc   : > { %v796_v61 = vmax.f32 %v741_v58, 0.0  ;;  %v932_v62 = vadd.f32 %v1958_v17, %v931_v59  ;;  %v994_v38 = vpop.f32.mrf.mxu3 }
 0x1dd   : > { %v995_v40 = vadd.f32 %v1958_v17, %v994_v38 }
 0x1de   : > { %v820_v63 = vpack.c.bf16 %v796_v61, %v795_v60  ;;  %1014 = vst [vmem:[%s1962_s24 + $0x28] sm:$0xff] %v932_v62 }
 0x1df   : > { %1039 = vst [vmem:[%s1962_s24 + $0xf0] sm:$0xff] %v995_v40 }
 0x1e0   : > { %1473 = vmatmul.msk.bf16.gmra.mxu2 %vm855_vm2, %v820_v63 }
 0x1e1   : > { %v743_v0 = vpop.f32.mrf.mxu1 }
 0x1e2   : > { %v744_v3 = vadd.f32 %v1898_v21, %v743_v0 }
 0x1e3   : > { %v934_v1 = vpop.f32.mrf.mxu2 }
 0x1e4   : > { %v935_v2 = vadd.f32 %v1958_v17, %v934_v1  ;;  %v797_v7 = vmax.f32 %v744_v3, 0.0  ;;  %v996_v42 = vpop.f32.mrf.mxu3 }
 0x1e5   : > { %v997_v45 = vadd.f32 %v1958_v17, %v996_v42 }
 0x1e6   : > { %1015 = vst [vmem:[%s1962_s24 + $0x30] sm:$0xff] %v935_v2 }
 0x1e7   : > { %1040 = vst [vmem:[%s1962_s24 + $0xf8] sm:$0xff] %v997_v45 }
 0x1e9   : > { %v745_v4 = vpop.f32.mrf.mxu1 }
 0x1ea   : > { %v746_v5 = vadd.f32 %v1898_v21, %v745_v4 }
 0x1eb   : > { %v936_v6 = vpop.f32.mrf.mxu2 }
 0x1ec   : > { %v798_v8 = vmax.f32 %v746_v5, 0.0  ;;  %v937_v9 = vadd.f32 %v1958_v17, %v936_v6 }
 0x1ee   : > { %v821_v10 = vpack.c.bf16 %v798_v8, %v797_v7  ;;  %1016 = vst [vmem:[%s1962_s24 + $0x38] sm:$0xff] %v937_v9 }
 0x1ef   : > { %v999_v46 = vpop.f32.mrf.mxu3 }
 0x1f0   : > { %1474 = vmatmul.msk.bf16.gmra.mxu2 %vm855_vm2, %v821_v10  ;;  %v1000_v48 = vadd.f32 %v1958_v17, %v999_v46 }
 0x1f1   : > { %v748_v11 = vpop.f32.mrf.mxu1 }
 0x1f2   : > { %v749_v14 = vadd.f32 %v1898_v21, %v748_v11  ;;  %1041 = vst [vmem:[%s1962_s24 + $0x100] sm:$0xff] %v1000_v48 }
 0x1f3   : > { %v939_v12 = vpop.f32.mrf.mxu2 }
 0x1f4   : > { %v940_v13 = vadd.f32 %v1958_v17, %v939_v12  ;;  %v799_v19 = vmax.f32 %v749_v14, 0.0 }
 0x1f6   : > { %1017 = vst [vmem:[%s1962_s24 + $0x40] sm:$0xff] %v940_v13 }
 0x1f7   : > { %v1001_v50 = vpop.f32.mrf.mxu3 }
 0x1f8   : > { %v1002_v52 = vadd.f32 %v1958_v17, %v1001_v50 }
 0x1f9   : > { %v750_v15 = vpop.f32.mrf.mxu1 }
 0x1fa   : > { %v751_v16 = vadd.f32 %v1898_v21, %v750_v15  ;;  %1042 = vst [vmem:[%s1962_s24 + $0x108] sm:$0xff] %v1002_v52 }
 0x1fb   : > { %v941_v18 = vpop.f32.mrf.mxu2 }
 0x1fc   : > { %v800_v20 = vmax.f32 %v751_v16, 0.0  ;;  %v942_v22 = vadd.f32 %v1958_v17, %v941_v18 }
 0x1fe   : > { %v822_v23 = vpack.c.bf16 %v800_v20, %v799_v19  ;;  %1018 = vst [vmem:[%s1962_s24 + $0x48] sm:$0xff] %v942_v22 }
 0x200   : > { %1475 = vmatmul.msk.bf16.gmra.mxu2 %vm855_vm2, %v822_v23 }
 0x203   : > { %v944_v24 = vpop.f32.mrf.mxu2 }
 0x204   : > { %v945_v25 = vadd.f32 %v1958_v17, %v944_v24 }
 0x206   : > { %1019 = vst [vmem:[%s1962_s24 + $0x50] sm:$0xff] %v945_v25 }
 0x20b   : > { %v946_v26 = vpop.f32.mrf.mxu2 }
 0x20c   : > { %v947_v21 = vadd.f32 %v1958_v17, %v946_v26 }
 0x20e   : > { %1020 = vst [vmem:[%s1962_s24 + $0x58] sm:$0xff] %v947_v21 }
 0x213   : > { %v949_v27 = vpop.f32.mrf.mxu2 }
 0x214   : > { %v950_v28 = vadd.f32 %v1958_v17, %v949_v27 }
 0x215   : > { %v1004_v54 = vpop.f32.mrf.mxu3 }
 0x216   : > { %1021 = vst [vmem:[%s1962_s24 + $0x60] sm:$0xff] %v950_v28  ;;  %v1005_v56 = vadd.f32 %v1958_v17, %v1004_v54 }
 0x218   : > { %1043 = vst [vmem:[%s1962_s24 + $0x110] sm:$0xff] %v1005_v56 }
 0x21b   : > { %v951_v29 = vpop.f32.mrf.mxu2 }
 0x21c   : > { %v952_v31 = vadd.f32 %v1958_v17, %v951_v29 }
 0x21d   : > { %v1006_v58 = vpop.f32.mrf.mxu3 }
 0x21e   : > { %1022 = vst [vmem:[%s1962_s24 + $0x68] sm:$0xff] %v952_v31  ;;  %v1007_v60 = vadd.f32 %v1958_v17, %v1006_v58 }
 0x220   : > { %1044 = vst [vmem:[%s1962_s24 + $0x118] sm:$0xff] %v1007_v60 }
 0x223   : > { %v954_v33 = vpop.f32.mrf.mxu2 }
 0x224   : > { %v955_v35 = vadd.f32 %v1958_v17, %v954_v33 }
 0x226   : > { %1023 = vst [vmem:[%s1962_s24 + $0x70] sm:$0xff] %v955_v35 }
 0x22b   : > { %v956_v37 = vpop.f32.mrf.mxu2 }
 0x22c   : > { %v957_v39 = vadd.f32 %v1958_v17, %v956_v37 }
 0x22e   : > { %1024 = vst [vmem:[%s1962_s24 + $0x78] sm:$0xff] %v957_v39 }
 0x233   : > { %v959_v41 = vpop.f32.mrf.mxu2 }
 0x234   : > { %v960_v44 = vadd.f32 %v1958_v17, %v959_v41 }
 0x236   : > { %1025 = vst [vmem:[%s1962_s24 + $0x80] sm:$0xff] %v960_v44 }
 0x23b   : > { %v961_v43 = vpop.f32.mrf.mxu2 }
 0x23c   : > { %v962_v47 = vadd.f32 %v1958_v17, %v961_v43 }
 0x23e   : > { %1026 = vst [vmem:[%s1962_s24 + $0x88] sm:$0xff] %v962_v47 }
 0x243   : > { %v964_v49 = vpop.f32.mrf.mxu2 }
 0x244   : > { %v965_v51 = vadd.f32 %v1958_v17, %v964_v49 }
 0x246   : > { %1027 = vst [vmem:[%s1962_s24 + $0x90] sm:$0xff] %v965_v51 }
 0x24b   : > { %v966_v53 = vpop.f32.mrf.mxu2 }
 0x24c   : > { %v967_v55 = vadd.f32 %v1958_v17, %v966_v53 }
 0x24e   : > { %1028 = vst [vmem:[%s1962_s24 + $0x98] sm:$0xff] %v967_v55 }
 0x253   : > { %v969_v57 = vpop.f32.mrf.mxu2 }
 0x254   : > { %v970_v59 = vadd.f32 %v1958_v17, %v969_v57 }
 0x256   : > { %1029 = vst [vmem:[%s1962_s24 + $0xa0] sm:$0xff] %v970_v59 }
 0x25b   : > { %v971_v61 = vpop.f32.mrf.mxu2 }
 0x25c   : > { %v972_v62 = vadd.f32 %v1958_v17, %v971_v61 }
 0x25e   : > { %1030 = vst [vmem:[%s1962_s24 + $0xa8] sm:$0xff] %v972_v62 }
 0x263   : > { %v974_v63 = vpop.f32.mrf.mxu2 }
 0x264   : > { %v975_v0 = vadd.f32 %v1958_v17, %v974_v63 }
 0x266   : > { %1031 = vst [vmem:[%s1962_s24 + $0xb0] sm:$0xff] %v975_v0 }
 0x26b   : > { %v976_v1 = vpop.f32.mrf.mxu2 }
 0x26c   : > { %v977_v2 = vadd.f32 %v1958_v17, %v976_v1 }
 0x26e   : > { %1032 = vst [vmem:[%s1962_s24 + $0xb8] sm:$0xff] %v977_v2 }
 0x273   : > { %v979_v3 = vpop.f32.mrf.mxu2 }
 0x274   : > { %v980_v4 = vadd.f32 %v1958_v17, %v979_v3 }
 0x276   : > { %1033 = vst [vmem:[%s1962_s24 + $0xc0] sm:$0xff] %v980_v4 }
 0x27b   : > { %v981_v5 = vpop.f32.mrf.mxu2 }
 0x27c   : > { %v982_v6 = vadd.f32 %v1958_v17, %v981_v5 }
 0x27e   : > { %1034 = vst [vmem:[%s1962_s24 + $0xc8] sm:$0xff] %v982_v6 }
 0x283   : > { %v984_v7 = vpop.f32.mrf.mxu2 }
 0x284   : > { %v985_v8 = vadd.f32 %v1958_v17, %v984_v7 }
 0x286   : > { %1035 = vst [vmem:[%s1962_s24 + $0xd0] sm:$0xff] %v985_v8 }
 0x28a   : > { %1051 = sbr.rel (!%p1761_p4) target bundleno = 719 (0x2cf), region = 52 }
 0x28b   : > { %v986_v9 = vpop.f32.mrf.mxu2 }
 0x28c   : > { %v987_v10 = vadd.f32 %v1958_v17, %v986_v9 }
 0x28e   : > { %1036 = vst [vmem:[%s1962_s24 + $0xd8] sm:$0xff] %v987_v10 }
 0x28f   : > { %s2214_s30 = smov (!%p1054_p8, %s1053_s30), 36 }
 0x290   : > { %s1480_s15 = sshll.u32 %s2214_s30, 3 }
 0x291   : > { %p1483_p9 = scmp.eq.s32.totalorder %s1480_s15, 0 }
 0x292   : > { %s2067_s16 = sshrl.u32 (!%p1483_p9), %s2214_s30, 5 }
 0x293   : > { %1062 = sbr.rel (%p1483_p9) target bundleno = 719 (0x2cf), region = 56  ;;  %p1484_p10 = scmp.le.s32.totalorder (!%p1483_p9), %s2067_s16, 0 }
 0x298   : > { %1341 = sbr.rel (%p1484_p10) target bundleno = 702 (0x2be), region = 132  ;;  %s2205_s27 = smov (!%p1484_p10), %s2061_s14 }
 0x299   : > { %s2206_s9 = smov (!%p1484_p10), %s1962_s24  ;;  %s2076_s12 = smov (!%p1484_p10), 0  }
 0x29a   : > { %s2078_s17 = smov (!%p1484_p10), 0  }
 0x29d LB: >> { %v1187_v17 = vld [vmem:[%s1670_s9] sm:$0xff]  ;;  %v1189_v11 = vld [vmem:[%s1670_s9 + $0x8] sm:$0xff]  ;;  %v1191_v12 = vld [vmem:[%s1670_s9 + $0x10] sm:$0xff]  ;;  %s1251_s18 = sadd.s32 1, %s1674_s12  ;;  %s1181_s17 = sadd.s32 1, %s1678_s17   ;;  %s1678_s17 = sphi %s2078_s17, %s1181_s17   ;;  %s1674_s12 = sphi %s2076_s12, %s2209_s12   ;;  %s1670_s9 = sphi %s2206_s9, %s2208_s9   ;;  %s1666_s27 = sphi %s2205_s27, %s2207_s27  }
 0x29e   : >> { %1188 = vst [vmem:[%s1666_s27] sm:$0xff] %v1187_v17  ;;  %v1193_v13 = vld [vmem:[%s1670_s9 + $0x18] sm:$0xff]  ;;  %p1252_p11 = scmp.ge.s32.totalorder %s1251_s18, %s2067_s16  ;;  %v1195_v14 = vld [vmem:[%s1670_s9 + $0x20] sm:$0xff]  ;;  %v1197_v15 = vld [vmem:[%s1670_s9 + $0x28] sm:$0xff]  ;;  %p1180_p12 = scmp.ge.s32.totalorder %s1181_s17, %s2067_s16 }
 0x29f   : >> { %1190 = vst [vmem:[%s1666_s27 + $0x8] sm:$0xff] %v1189_v11  ;;  %v1199_v16 = vld [vmem:[%s1670_s9 + $0x30] sm:$0xff]  ;;  %v1201_v18 = vld [vmem:[%s1670_s9 + $0x38] sm:$0xff]  ;;  %v1203_v19 = vld [vmem:[%s1670_s9 + $0x40] sm:$0xff] }
 0x2a0   : >> { %1192 = vst [vmem:[%s1666_s27 + $0x10] sm:$0xff] %v1191_v12  ;;  %s2216_s18 = smov (%p1252_p11, %s1251_s18), 0  ;;  %v1205_v20 = vld [vmem:[%s1670_s9 + $0x48] sm:$0xff]  ;;  %v1207_v22 = vld [vmem:[%s1670_s9 + $0x50] sm:$0xff]  ;;  %v1209_v23 = vld [vmem:[%s1670_s9 + $0x58] sm:$0xff] }
 0x2a1   : >> { %1194 = vst [vmem:[%s1666_s27 + $0x18] sm:$0xff] %v1193_v13  ;;  %s1485_s19 = sshll.u32 %s2216_s18, 8  ;;  %v1211_v24 = vld [vmem:[%s1670_s9 + $0x60] sm:$0xff]  ;;  %v1213_v25 = vld [vmem:[%s1670_s9 + $0x68] sm:$0xff]  ;;  %v1215_v26 = vld [vmem:[%s1670_s9 + $0x70] sm:$0xff]  ;;  %s2209_s12 = smov %s2216_s18 }
 0x2a2   : >> { %1196 = vst [vmem:[%s1666_s27 + $0x20] sm:$0xff] %v1195_v14  ;;  %s2110_s20 = scalar_lea.vmem %s1962_s24, %s1485_s19 [#allocation2]   ;;  %s2113_s21 = scalar_lea.vmem %s2061_s14, %s1485_s19   ;;  %v1217_v21 = vld [vmem:[%s1670_s9 + $0x78] sm:$0xff]  ;;  %v1219_v27 = vld [vmem:[%s1670_s9 + $0x80] sm:$0xff]  ;;  %v1221_v28 = vld [vmem:[%s1670_s9 + $0x88] sm:$0xff] }
 0x2a3   : >> { %1198 = vst [vmem:[%s1666_s27 + $0x28] sm:$0xff] %v1197_v15  ;;  %v1223_v29 = vld [vmem:[%s1670_s9 + $0x90] sm:$0xff]  ;;  %v1225_v30 = vld [vmem:[%s1670_s9 + $0x98] sm:$0xff]  ;;  %v1227_v31 = vld [vmem:[%s1670_s9 + $0xa0] sm:$0xff] }
 0x2a4   : >> { %1200 = vst [vmem:[%s1666_s27 + $0x30] sm:$0xff] %v1199_v16  ;;  %v1229_v32 = vld [vmem:[%s1670_s9 + $0xa8] sm:$0xff]  ;;  %v1231_v33 = vld [vmem:[%s1670_s9 + $0xb0] sm:$0xff]  ;;  %v1233_v34 = vld [vmem:[%s1670_s9 + $0xb8] sm:$0xff] }
 0x2a5   : >> { %1202 = vst [vmem:[%s1666_s27 + $0x38] sm:$0xff] %v1201_v18  ;;  %v1235_v35 = vld [vmem:[%s1670_s9 + $0xc0] sm:$0xff]  ;;  %v1237_v36 = vld [vmem:[%s1670_s9 + $0xc8] sm:$0xff]  ;;  %v1239_v37 = vld [vmem:[%s1670_s9 + $0xd0] sm:$0xff] }
 0x2a6   : >> { %1204 = vst [vmem:[%s1666_s27 + $0x40] sm:$0xff] %v1203_v19  ;;  %v1241_v38 = vld [vmem:[%s1670_s9 + $0xd8] sm:$0xff]  ;;  %v1243_v39 = vld [vmem:[%s1670_s9 + $0xe0] sm:$0xff]  ;;  %v1245_v40 = vld [vmem:[%s1670_s9 + $0xe8] sm:$0xff] }
 0x2a7   : >> { %1206 = vst [vmem:[%s1666_s27 + $0x48] sm:$0xff] %v1205_v20  ;;  %v1247_v41 = vld [vmem:[%s1670_s9 + $0xf0] sm:$0xff]  ;;  %v1249_v42 = vld [vmem:[%s1670_s9 + $0xf8] sm:$0xff]  ;;  %s2208_s9 = smov %s2110_s20 }
 0x2a8   : >> { %1208 = vst [vmem:[%s1666_s27 + $0x50] sm:$0xff] %v1207_v22 }
 0x2a9   : >> { %1210 = vst [vmem:[%s1666_s27 + $0x58] sm:$0xff] %v1209_v23 }
 0x2aa   : >> { %1212 = vst [vmem:[%s1666_s27 + $0x60] sm:$0xff] %v1211_v24 }
 0x2ab   : >> { %1214 = vst [vmem:[%s1666_s27 + $0x68] sm:$0xff] %v1213_v25 }
 0x2ac   : >> { %1216 = vst [vmem:[%s1666_s27 + $0x70] sm:$0xff] %v1215_v26 }
 0x2ad   : >> { %1218 = vst [vmem:[%s1666_s27 + $0x78] sm:$0xff] %v1217_v21 }
 0x2ae   : >> { %1220 = vst [vmem:[%s1666_s27 + $0x80] sm:$0xff] %v1219_v27 }
 0x2af   : >> { %1222 = vst [vmem:[%s1666_s27 + $0x88] sm:$0xff] %v1221_v28 }
 0x2b0   : >> { %1224 = vst [vmem:[%s1666_s27 + $0x90] sm:$0xff] %v1223_v29 }
 0x2b1   : >> { %1226 = vst [vmem:[%s1666_s27 + $0x98] sm:$0xff] %v1225_v30 }
 0x2b2   : >> { %1228 = vst [vmem:[%s1666_s27 + $0xa0] sm:$0xff] %v1227_v31 }
 0x2b3   : >> { %1230 = vst [vmem:[%s1666_s27 + $0xa8] sm:$0xff] %v1229_v32 }
 0x2b4   : >> { %1232 = vst [vmem:[%s1666_s27 + $0xb0] sm:$0xff] %v1231_v33 }
 0x2b5   : >> { %1234 = vst [vmem:[%s1666_s27 + $0xb8] sm:$0xff] %v1233_v34 }
 0x2b6   : >> { %1236 = vst [vmem:[%s1666_s27 + $0xc0] sm:$0xff] %v1235_v35 }
 0x2b7   : >> { %1238 = vst [vmem:[%s1666_s27 + $0xc8] sm:$0xff] %v1237_v36 }
 0x2b8   : >> { %1240 = vst [vmem:[%s1666_s27 + $0xd0] sm:$0xff] %v1239_v37 }
 0x2b9   : >> { %1242 = vst [vmem:[%s1666_s27 + $0xd8] sm:$0xff] %v1241_v38  ;;  %1183 = sbr.rel (!%p1180_p12) target bundleno = 669 (0x29d), region = 138 }
 0x2ba   : >> { %1244 = vst [vmem:[%s1666_s27 + $0xe0] sm:$0xff] %v1243_v39 }
 0x2bb   : >> { %1246 = vst [vmem:[%s1666_s27 + $0xe8] sm:$0xff] %v1245_v40 }
 0x2bc   : >> { %1248 = vst [vmem:[%s1666_s27 + $0xf0] sm:$0xff] %v1247_v41 }
 0x2bd   : >> { %1250 = vst [vmem:[%s1666_s27 + $0xf8] sm:$0xff] %v1249_v42  ;;  %s2207_s27 = smov %s2113_s21 }
 0x2be PF: > { %s2178_s22 = sand.u32 31, %s2214_s30   ;;  %s1505_s23 = sshll.u32 %s2067_s16, 8 }
 0x2bf   : > { %s1262_s26 = scalar_lea.vmem %s1962_s24, %s1505_s23 [#allocation2]   ;;  %s1264_s29 = scalar_lea.vmem %s2061_s14, %s1505_s23  }
 0x2c0   : > { %p1490_p13 = scmp.le.s32.totalorder %s2178_s22, 0 }
 0x2c1   : > { %s1680_s10 = smov (!%p1490_p13), %s1264_s29   ;;  %s1684_s11 = smov (!%p1490_p13), %s1262_s26  }
 0x2c2   : > { %1355 = sbr.rel (%p1490_p13) target bundleno = 719 (0x2cf), region = 143  ;;  %s1688_s13 = smov (!%p1490_p13), 0  }
 0x2c3   : > { %s1692_s15 = smov (!%p1490_p13), 0  }
 0x2c7 LB: >> { %v1274_v44 = vld [vmem:[%s1686_s11] sm:$0xff]  ;;  %s1276_s30 = sadd.s32 1, %s1690_s13  ;;  %s1268_s15 = sadd.s32 1, %s1694_s15   ;;  %s1694_s15 = sphi %s1692_s15, %s1268_s15   ;;  %s1690_s13 = sphi %s1688_s13, %s1689_s13   ;;  %s1686_s11 = sphi %s1684_s11, %s1281_s11   ;;  %s1682_s10 = sphi %s1680_s10, %s1282_s10  }
 0x2c8   : >> { %1275 = vst [vmem:[%s1682_s10] sm:$0xff] %v1274_v44  ;;  %p1277_p0 = scmp.ge.s32.totalorder %s1276_s30, %s2178_s22  ;;  %p1267_p1 = scmp.ge.s32.totalorder %s1268_s15, %s2178_s22 }
 0x2ca   : >> { %s2218_s30 = smov (%p1277_p0, %s1276_s30), 0  ;;  %1270 = sbr.rel (!%p1267_p1) target bundleno = 711 (0x2c7), region = 149 }
 0x2cb   : >> { %s1491_s24 = sshll.u32 %s2218_s30, 3  ;;  %s1689_s13 = smov %s2218_s30  }
 0x2cc   : >> { %s1281_s11 = scalar_lea.vmem %s1262_s26, %s1491_s24 [#allocation2]   ;;  %s1282_s10 = scalar_lea.vmem %s1264_s29, %s1491_s24  }
 0x2cf PF: > { %p14_p2 = scmp.ge.s32.totalorder %s1751_s28, 4   ;;  %s2210_s24 = smov %s1658_s25 }
 0x2d0   : > { %s2211_s25 = smov %s1759_s8  ;;  %s2212_s26 = smov %s1751_s28 }
 0x2d1   :  { %16 = sbr.rel (!%p14_p2) target bundleno = 2 (0x2), region = 160 }

</bundles_post_ra>
